<compile_context>
chip_gen: v7x
topology: tpu7x:2x2x1
jax: 0.10.0
libtpu: 0.0.40
codegen_flags: <defaults>
</compile_context>

<pallas_src>
import functools
import math

import jax
import jax.numpy as jnp
from jax import lax
from jax.experimental import pallas as pl
from jax.experimental.pallas import tpu as pltpu


def _round_up(x: int, m: int) -> int:
    return ((x + m - 1) // m) * m


def build_sincos_table(model_dim: int, max_pos: int = 1200,
                       temperature: float = 10000.0) -> jax.Array:
    """Replicates PositionalEmbedding2D.__init__'s registered buffer (f32)."""
    assert model_dim % 4 == 0, "model_dim must be a multiple of 4"
    dim_pe = model_dim // 2
    positions = jnp.arange(max_pos, dtype=jnp.float32)[:, None]
    div_term = jnp.exp(
        jnp.arange(0, dim_pe, 2, dtype=jnp.float32)
        * -(jnp.log(jnp.float32(temperature)) / dim_pe))
    angles = positions * div_term                            # (max_pos, dim_pe // 2)
    table = jnp.zeros((max_pos, dim_pe), jnp.float32)
    table = table.at[:, 0::2].set(jnp.sin(angles))
    table = table.at[:, 1::2].set(jnp.cos(angles))
    return table


def prepare_kernel_table(table_f32: jax.Array) -> jax.Array:
    """Pad rows to a multiple of 128 (MXU contraction dim) and cast to bf16."""
    max_pos, _ = table_f32.shape
    max_pos_pad = _round_up(max_pos, 128)
    t = jnp.pad(table_f32, ((0, max_pos_pad - max_pos), (0, 0)))
    return t.astype(jnp.bfloat16)


def _pick_tile(n: int, tile_n: int, model_dim: int, max_pos_pad: int,
               x_itemsize: int) -> int:
    """Largest multiple-of-8 tile <= tile_n whose working set fits the budget."""
    tile = min(tile_n, _round_up(n, 8))
    tile = max(8, (tile // 8) * 8)

    def tile_bytes(t):
        io = 2 * 2 * t * model_dim * x_itemsize      # x + out, double-buffered
        onehot = 2 * t * max_pos_pad * 2             # two bf16 one-hot temporaries
        emb = t * model_dim * 4                      # f32 embedding temporary
        idx = 2 * 2 * t * 4                          # rows/cols, double-buffered
        return io + onehot + emb + idx

    budget = 24 * 1024 * 1024                        # conservative across v5e/v6e/v7x
    while tile > 8 and tile_bytes(tile) > budget:
        tile = max(8, ((tile // 2) // 8) * 8)
    return tile


def _pos_embed_kernel(x_ref, rows_ref, cols_ref, table_ref, o_ref):
    # x_ref:     (tile, model_dim)            VMEM
    # rows_ref:  (tile, 1) int32              VMEM
    # cols_ref:  (tile, 1) int32              VMEM
    # table_ref: (max_pos_pad, dim_pe) bf16   VMEM-resident (single buffer)
    # o_ref:     (tile, model_dim)            VMEM
    max_pos_pad = table_ref.shape[0]
    table = table_ref[...]

    lane_iota = lax.broadcasted_iota(jnp.int32, (1, max_pos_pad), 1)
    oh_rows = (lane_iota == rows_ref[...]).astype(table.dtype)   # (tile, max_pos_pad)
    oh_cols = (lane_iota == cols_ref[...]).astype(table.dtype)   # (tile, max_pos_pad)

    # MXU gather: one_hot @ table == table[idx]; two half matmuls (rows / cols).
    emb_r = jnp.dot(oh_rows, table, preferred_element_type=jnp.float32)
    emb_c = jnp.dot(oh_cols, table, preferred_element_type=jnp.float32)
    emb = jnp.concatenate([emb_r, emb_c], axis=-1)               # (tile, model_dim)

    o_ref[...] = (x_ref[...].astype(jnp.float32) + emb).astype(o_ref.dtype)


@functools.partial(jax.jit, static_argnames=("tile_n",))
def positional_embedding_2d(x, positions, table, *, tile_n: int = 512):
    """x: (..., model_dim); positions: (..., 2) int; table: (max_pos_pad, dim_pe) bf16."""
    *lead, model_dim = x.shape
    max_pos_pad, dim_pe = table.shape
    assert model_dim == 2 * dim_pe, "table second dim must be model_dim // 2"

    n = math.prod(lead) if lead else 1
    x_flat = x.reshape(n, model_dim)
    pos_flat = positions.reshape(n, 2).astype(jnp.int32)
    rows = pos_flat[:, 0:1]                                      # (n, 1)
    cols = pos_flat[:, 1:2]                                      # (n, 1)

    x_itemsize = jnp.dtype(x.dtype).itemsize
    tile = _pick_tile(n, tile_n, model_dim, max_pos_pad, x_itemsize)
    n_pad = _round_up(n, tile)
    if n_pad != n:
        pad = n_pad - n
        x_flat = jnp.pad(x_flat, ((0, pad), (0, 0)))
        rows = jnp.pad(rows, ((0, pad), (0, 0)))   # index 0 is a safe pad value
        cols = jnp.pad(cols, ((0, pad), (0, 0)))

    # Explicit scoped-VMEM limit computed from the actual buffers (+ headroom).
    table_bytes = max_pos_pad * dim_pe * 2
    io_bytes = 2 * 2 * tile * model_dim * x_itemsize
    temp_bytes = 2 * tile * max_pos_pad * 2 + tile * model_dim * 4 + 2 * 2 * tile * 4
    vmem_limit = min(64 * 1024 * 1024,
                     max(16 * 1024 * 1024,
                         table_bytes + io_bytes + temp_bytes + (4 << 20)))

    cost = pl.CostEstimate(
        flops=2 * 2 * n_pad * max_pos_pad * dim_pe,              # two half gather-matmuls
        transcendentals=0,
        bytes_accessed=(2 * n_pad * model_dim * x_itemsize       # x in + out
                        + 2 * n_pad * 4                          # rows + cols
                        + table_bytes),
    )

    out_flat = pl.pallas_call(
        _pos_embed_kernel,
        out_shape=jax.ShapeDtypeStruct((n_pad, model_dim), x.dtype),
        grid_spec=pltpu.PrefetchScalarGridSpec(
            num_scalar_prefetch=0,
            grid=(n_pad // tile,),
            in_specs=[
                pl.BlockSpec((tile, model_dim), lambda i: (i, 0)),   # x tile
                pl.BlockSpec((tile, 1), lambda i: (i, 0)),           # rows tile
                pl.BlockSpec((tile, 1), lambda i: (i, 0)),           # cols tile
                pl.BlockSpec(memory_space=pltpu.MemorySpace.VMEM),   # resident table
            ],
            out_specs=pl.BlockSpec((tile, model_dim), lambda i: (i, 0)),
        ),
        compiler_params=pltpu.CompilerParams(
            dimension_semantics=("parallel",),
            vmem_limit_bytes=int(vmem_limit)),
        cost_estimate=cost,
    )(x_flat, rows, cols, table)

    return out_flat[:n].reshape(x.shape)


if __name__ == "__main__":
    # Small deterministic setup consistent with the module's forward.
    model_dim = 32
    max_pos = 16
    batch, seq = 2, 8

    key = jax.random.PRNGKey(0)
    k_x, k_p0, k_p1 = jax.random.split(key, 3)

    table_f32 = build_sincos_table(model_dim, max_pos)      # (max_pos, dim_pe) f32
    table_kernel = prepare_kernel_table(table_f32)          # (128, dim_pe) bf16

    x = jax.random.normal(k_x, (batch, seq, model_dim), jnp.float32)
    positions = jnp.stack(
        [
            jax.random.randint(k_p0, (batch, seq), 0, max_pos),
            jax.random.randint(k_p1, (batch, seq), 0, max_pos),
        ],
        axis=-1,
    )  # (batch, seq, 2)

    out = positional_embedding_2d(x, positions, table_kernel)
    out = jax.block_until_ready(out)

    # Pure-JAX reference of the PyTorch semantics (f32 table).
    rows = positions[..., 0]
    cols = positions[..., 1]
    ref = x + jnp.concatenate([table_f32[rows], table_f32[cols]], axis=-1)

    assert out.shape == x.shape and out.dtype == x.dtype
    # Table is stored/gathered in bf16 -> ~1e-3 rounding on the embedding term.
    assert jnp.allclose(out, ref, atol=3e-3, rtol=3e-3)

    print("KERNEL_OK")
</pallas_src>

<mosaic_0001>
module attributes {stable_mosaic.version = 11 : i64} {
  func.func @_pos_embed_kernel(%arg0: i32, %arg1: memref<16x32xf32, #tpu.memory_space<vmem>>, %arg2: memref<16x1xi32, #tpu.memory_space<vmem>>, %arg3: memref<16x1xi32, #tpu.memory_space<vmem>>, %arg4: memref<128x16xbf16, #tpu.memory_space<vmem>>, %arg5: memref<16x32xf32, #tpu.memory_space<vmem>>) attributes {dimension_semantics = [#tpu.dimension_semantics<parallel>], iteration_bounds = array<i64: 1>, scalar_prefetch = 0 : i64, scratch_operands = 0 : i64, tpu.core_type = #tpu.core_type<tc>, window_params = [{transform_indices = @transform_0, window_bounds = array<i64: 16, 32>}, {transform_indices = @transform_1, window_bounds = array<i64: 16, 1>}, {transform_indices = @transform_2, window_bounds = array<i64: 16, 1>}, {pipeline_mode = #tpu.pipeline_mode<synchronous>, transform_indices = @transform_3, window_bounds = array<i64: 128, 16>}, {transform_indices = @transform_4, window_bounds = array<i64: 16, 32>}]} {
    %c0 = arith.constant 0 : index
    %c0_0 = arith.constant 0 : index
    %0 = vector.load %arg4[%c0, %c0_0] : memref<128x16xbf16, #tpu.memory_space<vmem>>, vector<128x16xbf16>
    %1 = tpu.iota {dimensions = array<i32: 1>} : vector<1x128xi32>
    %c0_1 = arith.constant 0 : index
    %c0_2 = arith.constant 0 : index
    %2 = vector.load %arg2[%c0_1, %c0_2] : memref<16x1xi32, #tpu.memory_space<vmem>>, vector<16x1xi32>
    %3 = vector.broadcast %1 : vector<1x128xi32> to vector<16x128xi32>
    %4 = vector.broadcast %2 : vector<16x1xi32> to vector<16x128xi32>
    %5 = arith.cmpi eq, %3, %4 : vector<16x128xi32>
    %6 = arith.extui %5 : vector<16x128xi1> to vector<16x128xi32>
    %7 = arith.sitofp %6 : vector<16x128xi32> to vector<16x128xf32>
    %8 = arith.truncf %7 : vector<16x128xf32> to vector<16x128xbf16>
    %c0_3 = arith.constant 0 : index
    %c0_4 = arith.constant 0 : index
    %9 = vector.load %arg3[%c0_3, %c0_4] : memref<16x1xi32, #tpu.memory_space<vmem>>, vector<16x1xi32>
    %10 = vector.broadcast %1 : vector<1x128xi32> to vector<16x128xi32>
    %11 = vector.broadcast %9 : vector<16x1xi32> to vector<16x128xi32>
    %12 = arith.cmpi eq, %10, %11 : vector<16x128xi32>
    %13 = arith.extui %12 : vector<16x128xi1> to vector<16x128xi32>
    %14 = arith.sitofp %13 : vector<16x128xi32> to vector<16x128xf32>
    %15 = arith.truncf %14 : vector<16x128xf32> to vector<16x128xbf16>
    %cst = arith.constant dense<0.000000e+00> : vector<16x16xf32>
    %16 = tpu.matmul %8, %0, %cst {dimension_numbers = #tpu.dot_dimension_numbers<[1], [0], [0], [1], [0, 0, 1, 1], [], []>} : vector<16x128xbf16>, vector<128x16xbf16>, vector<16x16xf32> -> vector<16x16xf32>
    %cst_5 = arith.constant dense<0.000000e+00> : vector<16x16xf32>
    %17 = tpu.matmul %15, %0, %cst_5 {dimension_numbers = #tpu.dot_dimension_numbers<[1], [0], [0], [1], [0, 0, 1, 1], [], []>} : vector<16x128xbf16>, vector<128x16xbf16>, vector<16x16xf32> -> vector<16x16xf32>
    %18 = tpu.concatenate %16, %17 in 1 : vector<16x16xf32>, vector<16x16xf32> -> vector<16x32xf32>
    %c0_6 = arith.constant 0 : index
    %c0_7 = arith.constant 0 : index
    %19 = vector.load %arg1[%c0_6, %c0_7] : memref<16x32xf32, #tpu.memory_space<vmem>>, vector<16x32xf32>
    %20 = arith.addf %19, %18 : vector<16x32xf32>
    %c0_8 = arith.constant 0 : index
    %c0_9 = arith.constant 0 : index
    %21 = vector.load %arg5[%c0_8, %c0_9] : memref<16x32xf32, #tpu.memory_space<vmem>>, vector<16x32xf32>
    tpu.vector_store %arg5[%c0_8, %c0_9], %20 {strides = array<i32>} : memref<16x32xf32, #tpu.memory_space<vmem>>, vector<16x32xf32>,
    return
  }
  func.func @transform_0(%arg0: i32) -> (i32, i32) {
    %c0_i32 = arith.constant 0 : i32
    %c0_i32_0 = arith.constant 0 : i32
    return %arg0, %c0_i32 : i32, i32
  }
  func.func @transform_1(%arg0: i32) -> (i32, i32) {
    %c0_i32 = arith.constant 0 : i32
    %c0_i32_0 = arith.constant 0 : i32
    return %arg0, %c0_i32 : i32, i32
  }
  func.func @transform_2(%arg0: i32) -> (i32, i32) {
    %c0_i32 = arith.constant 0 : i32
    %c0_i32_0 = arith.constant 0 : i32
    return %arg0, %c0_i32 : i32, i32
  }
  func.func @transform_3(%arg0: i32) -> (i32, i32) {
    %c0_i32 = arith.constant 0 : i32
    %c0_i32_0 = arith.constant 0 : i32
    %c0_i32_1 = arith.constant 0 : i32
    return %c0_i32, %c0_i32_0 : i32, i32
  }
  func.func @transform_4(%arg0: i32) -> (i32, i32) {
    %c0_i32 = arith.constant 0 : i32
    %c0_i32_0 = arith.constant 0 : i32
    return %arg0, %c0_i32 : i32, i32
  }
}

</mosaic_0001>

<bundles_post_ra>
// kernel: positional_embedding_2d.1
= control target key start
LH: loop header
LB: loop body
LE: loop exit
PB: predicated region body
PF: predicated region fallthrough
CT: control target
= control target key end

     0   :  { %v347_v1 = vmov 0   ;;  %v348_v2 = vmov 0.0   ;;  %vm349_vm0 = vmmov 0   ;;  %s434_s0 = inlined_call_operand.vmem [shape: f32[16,32], index: 0, kind: input, shape index: {}]   ;;  %s435_s1 = inlined_call_operand.vmem [shape: s32[16,1], index: 1, kind: input, shape index: {}]   ;;  %s436_s2 = inlined_call_operand.vmem [shape: s32[16,1], index: 2, kind: input, shape index: {}]   ;;  %s437_s3 = inlined_call_operand.vmem [shape: bf16[128,16], index: 3, kind: input, shape index: {}]   ;;  %s438_s4 = inlined_call_operand.hbm [shape: f32[16,32], index: 4, kind: output, shape index: {}]  }
   0x1   :  { %v52_v0 = vld [vmem:[%s436_s2] sm:$0xff]  ;;  %313 = vset.pattern.permute.xlu0 %v347_v1  ;;  %285 = vmatprep.subr.bf16.mxu1 %v348_v2  ;;  %v53_v4 = vld [vmem:[%s436_s2 + $0x8] sm:$0xff]  ;;  %v317_v8 = vld [vmem:[%s437_s3 + $0x10] sm:$0xff]  }
   0x2   :  { %v315_v3 = vld [vmem:[%s437_s3] sm:$0xff]   ;;  %55 = vperm.xlu0 %313, %v52_v0   ;;  %314 = vset.pattern.permute.xlu1 %v347_v1  ;;  %v316_v6 = vld [vmem:[%s437_s3 + $0x8] sm:$0xff]  }
   0x3   :  { %v37_v5 = vld [vmem:[%s435_s1] sm:$0xff]  ;;  %286 = vmatpush3.bf16.msra.mxu1 %v315_v3  ;;  %v38_v7 = vld [vmem:[%s435_s1 + $0x8] sm:$0xff]  ;;  %265 = vmatprep.subr.bf16.mxu0 %v348_v2 }
   0x4   :  { %40 = vperm.xlu1 %314, %v37_v5   ;;  %287 = vmatprep.subr.bf16.mxu1 %v348_v2 }
   0x5   :  { %266 = vmatpush3.bf16.msra.mxu0 %v315_v3  ;;  %301 = vmatprep.mubr.msk.bf16.mxu1 %vm349_vm0, %v348_v2 }
   0x6   :  { %58 = vperm.xlu0 %313, %v53_v4   ;;  %267 = vmatprep.subr.bf16.mxu0 %v348_v2 }
   0x7   :  { %288 = vmatpush3.bf16.msra.mxu1 %v316_v6  ;;  %281 = vmatprep.mubr.msk.bf16.mxu0 %vm349_vm0, %v348_v2 }
   0x8   :  { %43 = vperm.xlu1 %314, %v38_v7   ;;  %289 = vmatprep.subr.bf16.mxu1 %v348_v2 }
   0x9   :  { %268 = vmatpush3.bf16.msra.mxu0 %v316_v6 }
   0xa   :  { %9 = vsyncpa [#allocation3], 0  ;;  %269 = vmatprep.subr.bf16.mxu0 %v348_v2  ;;  %v318_v9 = vld [vmem:[%s437_s3 + $0x18] sm:$0xff]   ;;  %v319_v10 = vld [vmem:[%s437_s3 + $0x20] sm:$0xff]   ;;  %v35_v14 = vlaneseq  ;;  %v350_v20 = vmov 1.0|1.0  }
   0xb   :  { %290 = vmatpush3.bf16.msra.mxu1 %v317_v8  ;;  %v320_v11 = vld [vmem:[%s437_s3 + $0x28] sm:$0xff]   ;;  %v321_v12 = vld [vmem:[%s437_s3 + $0x30] sm:$0xff]   ;;  %v322_v13 = vld [vmem:[%s437_s3 + $0x38] sm:$0xff]   ;;  %s351_s3 = smov 16   ;;  %vm205_vm7 = vcmask 130048   ;;  %s352_s13 = smov [#allocation2]  }
   0xc   :  { %291 = vmatprep.subr.bf16.mxu1 %v348_v2  ;;  %v36_v16 = vand.u32 127, %v35_v14  ;;  %v208_v29 = vld [vmem:[%s434_s0] sm:$0xff]  ;;  %s220_s14 = sshll.u32 %s352_s13, 4  ;;  %vm212_vm8 = vcmask 261120   ;;  %v209_v32 = vld [vmem:[%s434_s0 + $0x8] sm:$0xff]  ;;  %s221_s14 = int_to_ptr.vmem [resolvable:$true] %s220_s14 }
   0xd   :  { %270 = vmatpush3.bf16.msra.mxu0 %v317_v8  ;;  %s323_s17 = scalar_lea.vmem %s221_s14, 256  ;;  %p328_p1 = scmp.lt.s32.totalorder %s221_s14, %s221_s14 }
   0xe   :  { %271 = vmatprep.subr.bf16.mxu0 %v348_v2  ;;  %p324_p0 = scmp.ne.s32.totalorder %s221_s14, %s323_s17  ;;  %p329_p2 = scmp.lt.s32.totalorder %s323_s17, %s323_s17 }
   0xf   :  { %292 = vmatpush3.bf16.msra.mxu1 %v318_v9 }
  0x10   :  { %293 = vmatprep.subr.bf16.mxu1 %v348_v2  ;;  %p330_p3 = por %p329_p2, %p328_p1 }
  0x11   :  { %272 = vmatpush3.bf16.msra.mxu0 %v318_v9 }
  0x12   :  { %273 = vmatprep.subr.bf16.mxu0 %v348_v2  ;;  %p331_p4 = pnand %p330_p3, %p324_p0 }
  0x13   :  { %294 = vmatpush3.bf16.msra.mxu1 %v319_v10 }
  0x14   :  { %295 = vmatprep.subr.bf16.mxu1 %v348_v2 }
  0x15   :  { %274 = vmatpush3.bf16.msra.mxu0 %v319_v10 }
  0x16   :  { %275 = vmatprep.subr.bf16.mxu0 %v348_v2 }
  0x17   :  { %296 = vmatpush3.bf16.msra.mxu1 %v320_v11 }
  0x18   :  { %297 = vmatprep.subr.bf16.mxu1 %v348_v2 }
  0x19   :  { %276 = vmatpush3.bf16.msra.mxu0 %v320_v11 }
  0x1a   :  { %277 = vmatprep.subr.bf16.mxu0 %v348_v2 }
  0x1b   :  { %298 = vmatpush3.bf16.msra.mxu1 %v321_v12 }
  0x1c   :  { %299 = vmatprep.subr.bf16.mxu1 %v348_v2 }
  0x1d   :  { %278 = vmatpush3.bf16.msra.mxu0 %v321_v12 }
  0x1e   :  { %279 = vmatprep.subr.bf16.mxu0 %v348_v2 }
  0x1f   :  { %300 = vmatpush3.bf16.msra.mxu1 %v322_v13 }
  0x21   :  { %280 = vmatpush3.bf16.msra.mxu0 %v322_v13 }
  0x81   :  { %v56_v15 = vpop.permute.xlu0 %55 }
  0x82   :  { %vm60_vm2 = vcmp.eq.s32.totalorder %v36_v16, %v56_v15 }
  0x83   :  { %v41_v17 = vpop.permute.xlu1 %40 }
  0x84   :  { %vm45_vm1 = vcmp.eq.s32.totalorder %v36_v16, %v41_v17 }
  0x85   :  { %v59_v18 = vpop.permute.xlu0 %58 }
  0x86   :  { %vm61_vm3 = vcmp.eq.s32.totalorder %v36_v16, %v59_v18 }
  0x87   :  { %v44_v19 = vpop.permute.xlu1 %43  ;;  %vm245_vm4 = vmpackc.low %vm61_vm3, %vm60_vm2 }
  0x88   :  { %vm46_vm5 = vcmp.eq.s32.totalorder %v36_v16, %v44_v19  ;;  %302 = vmatmul.mubr.msk.bf16.vlgmr.msra.gmra.mrb[0].mxu1 %vm245_vm4, %v350_v20 }
  0x89   :  { %vm243_vm6 = vmpackc.low %vm46_vm5, %vm45_vm1 }
  0x8a   :  { %282 = vmatmul.mubr.msk.bf16.vlgmr.msra.gmra.mrb[0].mxu0 %vm243_vm6, %v350_v20 }
 0x15b   :  { %v190_v21 = vpop.f32.mrb[0].mxu1 }
 0x15c   :  { %199 = vrot.lane.b32.xlu0 %v190_v21, %s351_s3  ;;  %v303_v22 = vpop.f32.mrb[1].mxu1 }
 0x15d   :  { %v149_v23 = vpop.f32.mrb[0].mxu0  ;;  %v193_v24 = vpop.f32.mrb[2].mxu1 }
 0x15e   :  { %v283_v25 = vpop.f32.mrb[1].mxu0  ;;  %201 = vrot.lane.b32.xlu1 %v193_v24, %s351_s3  ;;  %v304_v26 = vpop.f32.mrb[3].mxu1 }
 0x15f   :  { %v152_v27 = vpop.f32.mrb[2].mxu0 }
 0x160   :  { %v284_v28 = vpop.f32.mrb[3].mxu0 }
 0x1ce   :  { %v200_v30 = vpop.permute.xlu0 %199 }
 0x1cf   :  { %v206_v31 = vsel %vm205_vm7, %v149_v23, %v200_v30 }
 0x1d0   :  { %v210_v33 = vadd.f32 %v208_v29, %v206_v31  ;;  %v202_v34 = vpop.permute.xlu1 %201 }
 0x1d1   :  { %v207_v35 = vsel %vm205_vm7, %v152_v27, %v202_v34 }
 0x1d2   :  { %213 = vst.msk [vmem:[#allocation2] sm:$0xff] %vm212_vm8, %v210_v33  ;;  %v211_v36 = vadd.f32 %v209_v32, %v207_v35 }
 0x1d4   :  { %214 = vst.msk [vmem:[#allocation2 + $0x8] sm:$0xff] %vm212_vm8, %v211_v36 }
 0x1d5   :  { %334 = shalt.err (!%p331_p4)
}
 0x1d6   :  { %s335_s20 = scalar_lea.hbm %s438_s4, 256 }
 0x1d7   :  { %p336_p5 = scmp.ne.s32.totalorder %s438_s4, %s335_s20  ;;  %p339_p6 = scmp.lt.u32.totalorder %s335_s20, %s438_s4 }
 0x1d9   :  { %p341_p7 = pnand %p339_p6, %p336_p5 }
 0x1db   :  { %344 = shalt.err (!%p341_p7)
}
 0x1dc   :  { %s353_s24 = smov 128   ;;  %s354_s25 = smov 8  }
 0x1dd   :  { %226 = dma.vmem_to_hbm [thread:$0]  %s221_s14, 256, %s438_s4, [#allocation3], %s353_s24, %s353_s24, %s354_s25  }
 0x1de   :  { %345 = dma.done.wait [#allocation3], 256  }
 0x1df   :  { %346 = vsyncadd [#allocation3], 4294967040 }
 0x1e0   :  { %230 = vsyncpa [#allocation3], 1 }

</bundles_post_ra>
